<compile_context>
chip_gen: v7x
topology: tpu7x:2x2x1
jax: 0.10.0
libtpu: 0.0.40
codegen_flags: <defaults>
</compile_context>

<pallas_src>
import jax
import jax.numpy as jnp
from jax.experimental import pallas as pl
from jax.experimental.pallas import tpu as pltpu


def _gated_matmul_kernel(w2g_ref, x_ref, o_ref):
    # w2g_ref: [C, C]   conv2d12 weight with the SE gate folded into its columns (f32)
    # x_ref  : [C, T]   tile of the big activation (channels x spatial lanes), native dtype
    # o_ref  : [C, T]   output tile (native / requested dtype)
    w = w2g_ref[...]
    x = x_ref[...]
    if x.dtype != w.dtype:
        # Mixed precision (e.g. bf16 activation, f32 folded weight): promote the
        # narrow operand. Trivial VPU cost; the kernel stays HBM-bound.
        x = x.astype(jnp.float32)
        w = w.astype(jnp.float32)
    o_ref[...] = jnp.dot(w, x, preferred_element_type=jnp.float32).astype(o_ref.dtype)


def _choose_tile(hw, *, max_tile=6272, min_steps=2):
    """Largest lane tile (multiple of 128 dividing hw, <= max_tile) that keeps an
    even grid-step count >= min_steps (even split across v7x's 2 TensorCores);
    falls back to the largest valid tile, then to the full extent."""
    cands = [t for t in range(128, min(hw, max_tile) + 1, 128) if hw % t == 0]
    if not cands:
        return hw
    even = [t for t in cands if hw // t >= min_steps and (hw // t) % 2 == 0]
    if even:
        return max(even)
    good = [t for t in cands if hw // t >= min_steps]
    return max(good) if good else max(cands)


def se_conv_block(x33, x30, w1, b1, w2, *, out_dtype=None):
    """conv2d12(sigmoid(conv2d11(x33)) * x30) with 1x1 convs.

    x33: [1, C_se, 1, 1], x30: [1, C, H, W] -> [1, C, H, W] (out_dtype, default = x30.dtype).
    """
    n, c_se, _, _ = x33.shape
    n2, c, h, w_ = x30.shape
    assert n == 1 and n2 == 1, "reference module uses batch size 1"
    # TODO(synk): batched (N>1) use would need a leading grid axis; the module is N=1.
    hw = h * w_
    out_dtype = x30.dtype if out_dtype is None else out_dtype

    # ---- gate fold (exact algebra, tiny, wrapper-side) ----------------------
    x33_v = x33.reshape(c_se, 1).astype(jnp.float32)           # [C_se, 1]
    w1_2d = w1.reshape(c, c_se).astype(jnp.float32)            # [C, C_se]
    b1_v = b1.reshape(c, 1).astype(jnp.float32)                # [C, 1]
    gate = jax.nn.sigmoid(w1_2d @ x33_v + b1_v)                # [C, 1]
    w2_2d = w2.reshape(c, c).astype(jnp.float32)               # [C_out, C_in]
    # (W2 @ diag(g))[o, i] = W2[o, i] * g[i]  -> scale columns by the gate.
    w2g = w2_2d * gate.reshape(1, c)                           # [C, C], stays f32 (4 KiB)

    # Pure reshape (no dtype convert): no extra HBM pass before the kernel.
    x_2d = x30.reshape(c, hw)                                  # [C, HW], native dtype

    tile = _choose_tile(hw)
    grid = (hw // tile,)
    x_item = jnp.dtype(x_2d.dtype).itemsize
    o_item = jnp.dtype(out_dtype).itemsize

    out_2d = pl.pallas_call(
        _gated_matmul_kernel,
        out_shape=jax.ShapeDtypeStruct((c, hw), out_dtype),
        grid_spec=pltpu.PrefetchScalarGridSpec(
            num_scalar_prefetch=0,
            grid=grid,
            in_specs=[
                pl.BlockSpec((c, c), lambda i: (0, 0)),        # folded weight (resident)
                pl.BlockSpec((c, tile), lambda i: (0, i)),     # activation tile
            ],
            out_specs=pl.BlockSpec((c, tile), lambda i: (0, i)),
        ),
        compiler_params=pltpu.CompilerParams(
            dimension_semantics=("parallel",)),
        cost_estimate=pl.CostEstimate(
            flops=2 * c * c * hw,
            transcendentals=0,
            bytes_accessed=c * hw * x_item          # activation read (native dtype)
            + c * c * 4                             # folded f32 weight read
            + c * hw * o_item,                      # output write
        ),
    )(w2g, x_2d)

    return out_2d.reshape(1, c, h, w_)


def _reference(x33, x30, w1, b1, w2):
    # plain-JAX f32 reference of the PyTorch forward (1x1 convs as matmuls)
    c_se = x33.shape[1]
    c, h, w = x30.shape[1], x30.shape[2], x30.shape[3]
    s = jax.nn.sigmoid(w1.reshape(c, c_se) @ x33.reshape(c_se, 1)
                       + b1.reshape(c, 1))                     # [C, 1]
    y = s[None, :, :, None] * x30.astype(jnp.float32)          # broadcast mul (NCHW)
    y2 = w2.reshape(c, c) @ y.reshape(c, h * w)
    return y2.reshape(1, c, h, w)


if __name__ == "__main__":
    key = jax.random.PRNGKey(0)
    k1, k2, k3, k4, k5 = jax.random.split(key, 5)

    # Module-fixed channel counts (8 -> 32 squeeze, 32 -> 32 expand);
    # small spatial 32x32 -> tile 512, 2 grid steps.
    H, W = 32, 32
    x33 = jax.random.normal(k1, (1, 8, 1, 1), dtype=jnp.float32)
    x30 = jax.random.normal(k2, (1, 32, H, W), dtype=jnp.float32)

    w1 = jax.random.normal(k3, (32, 8, 1, 1), dtype=jnp.float32) * 0.1
    b1 = jax.random.normal(k4, (32,), dtype=jnp.float32) * 0.1
    w2 = jax.random.normal(k5, (32, 32, 1, 1), dtype=jnp.float32) * 0.1

    ref = _reference(x33, x30, w1, b1, w2)

    # Default path: f32 activation read, f32 output, f32 folded weight -> tight.
    out = jax.block_until_ready(se_conv_block(x33, x30, w1, b1, w2))
    assert out.shape == (1, 32, H, W)
    assert out.dtype == jnp.float32
    assert jnp.allclose(out, ref, atol=1e-4, rtol=1e-4), float(
        jnp.max(jnp.abs(out - ref)))

    # bf16-producer path: activation arrives bf16 (no wrapper convert), bf16 output.
    out_bf16 = jax.block_until_ready(
        se_conv_block(x33, x30.astype(jnp.bfloat16), w1, b1, w2,
                      out_dtype=jnp.bfloat16))
    assert out_bf16.dtype == jnp.bfloat16
    assert jnp.allclose(out_bf16.astype(jnp.float32), ref, atol=5e-2, rtol=5e-2), float(
        jnp.max(jnp.abs(out_bf16.astype(jnp.float32) - ref)))

    # Production spatial extent (112x112 -> tile 6272, 2 grid steps); data is
    # still tiny (~1.6 MB) but exercises the real tiling path.
    Hp, Wp = 112, 112
    x30p = jax.random.normal(k2, (1, 32, Hp, Wp), dtype=jnp.float32)
    refp = _reference(x33, x30p, w1, b1, w2)
    outp = jax.block_until_ready(se_conv_block(x33, x30p, w1, b1, w2))
    assert outp.shape == (1, 32, Hp, Wp)
    assert jnp.allclose(outp, refp, atol=1e-4, rtol=1e-4), float(
        jnp.max(jnp.abs(outp - refp)))

    print("KERNEL_OK")
</pallas_src>

<mosaic_0001>
module attributes {stable_mosaic.version = 11 : i64} {
  func.func @_gated_matmul_kernel(%arg0: i32, %arg1: memref<32x32xf32, #tpu.memory_space<vmem>>, %arg2: memref<32x512xf32, #tpu.memory_space<vmem>>, %arg3: memref<32x512xf32, #tpu.memory_space<vmem>>) attributes {dimension_semantics = [#tpu.dimension_semantics<parallel>], iteration_bounds = array<i64: 2>, scalar_prefetch = 0 : i64, scratch_operands = 0 : i64, tpu.core_type = #tpu.core_type<tc>, window_params = [{pipeline_mode = #tpu.pipeline_mode<synchronous>, transform_indices = @transform_0, window_bounds = array<i64: 32, 32>}, {transform_indices = @transform_1, window_bounds = array<i64: 32, 512>}, {transform_indices = @transform_2, window_bounds = array<i64: 32, 512>}]} {
    %c0 = arith.constant 0 : index
    %c0_0 = arith.constant 0 : index
    %0 = vector.load %arg1[%c0, %c0_0] : memref<32x32xf32, #tpu.memory_space<vmem>>, vector<32x32xf32>
    %c0_1 = arith.constant 0 : index
    %c0_2 = arith.constant 0 : index
    %1 = vector.load %arg2[%c0_1, %c0_2] : memref<32x512xf32, #tpu.memory_space<vmem>>, vector<32x512xf32>
    %cst = arith.constant dense<0.000000e+00> : vector<32x512xf32>
    %2 = tpu.matmul %0, %1, %cst {dimension_numbers = #tpu.dot_dimension_numbers<[1], [0], [0], [1], [0, 0, 1, 1], [], []>} : vector<32x32xf32>, vector<32x512xf32>, vector<32x512xf32> -> vector<32x512xf32>
    %c0_3 = arith.constant 0 : index
    %c0_4 = arith.constant 0 : index
    %3 = vector.load %arg3[%c0_3, %c0_4] : memref<32x512xf32, #tpu.memory_space<vmem>>, vector<32x512xf32>
    tpu.vector_store %arg3[%c0_3, %c0_4], %2 {strides = array<i32>} : memref<32x512xf32, #tpu.memory_space<vmem>>, vector<32x512xf32>,
    return
  }
  func.func @transform_0(%arg0: i32) -> (i32, i32) {
    %c0_i32 = arith.constant 0 : i32
    %c0_i32_0 = arith.constant 0 : i32
    %c0_i32_1 = arith.constant 0 : i32
    return %c0_i32, %c0_i32_0 : i32, i32
  }
  func.func @transform_1(%arg0: i32) -> (i32, i32) {
    %c0_i32 = arith.constant 0 : i32
    %c0_i32_0 = arith.constant 0 : i32
    return %c0_i32, %arg0 : i32, i32
  }
  func.func @transform_2(%arg0: i32) -> (i32, i32) {
    %c0_i32 = arith.constant 0 : i32
    %c0_i32_0 = arith.constant 0 : i32
    return %c0_i32, %arg0 : i32, i32
  }
}

</mosaic_0001>

<bundles_post_ra>
// kernel: tpu_custom_call.1
= control target key start
LH: loop header
LB: loop body
LE: loop exit
PB: predicated region body
PF: predicated region fallthrough
CT: control target
= control target key end

     0   :  { %7 = vsyncpa [#allocation3], 0  ;;  %s1019_s0 = inlined_call_operand.hbm [shape: f32[32,32], index: 0, kind: input, shape index: {}]   ;;  %s1020_s1 = inlined_call_operand.hbm [shape: f32[32,1024], index: 1, kind: input, shape index: {}]   ;;  %s1021_s2 = inlined_call_operand.hbm [shape: f32[32,1024], index: 2, kind: output, shape index: {}]  }
   0x1   :  { %8 = vsyncpa [#allocation6], 0 }
   0x2   :  { %10 = vsyncpa [#allocation6 + $0x1], 0 }
   0x3   :  { %11 = vsyncpa [#allocation4], 0 }
   0x4   :  { %13 = vsyncpa [#allocation4 + $0x1], 0  ;;  %s770_s9 = smov 0   ;;  %s772_s10 = smov 0  }
   0x5   :  { %s774_s11 = smov 0   ;;  %s776_s12 = smov 0  }
   0x6 LB: > { %s791_s13 = sadd.s32 4294967295, %s741_s12   ;;  %s505_s14 = sadd.s32 4294967294, %s741_s12   ;;  %s741_s12 = sphi %s776_s12, %s1045_s12   ;;  %s737_s11 = sphi %s774_s11, %s1044_s11   ;;  %s733_s10 = sphi %s772_s10, %s1043_s10   ;;  %s729_s9 = sphi %s770_s9, %s1042_s9  }
   0x7   : > { %s795_s15 = sadd.s32 1, %s741_s12   ;;  %s47_s16 = sadd.s32 1, %s737_s11 }
   0x8   : > { %s44_s17 = ssub.s32 %s741_s12, %s795_s15  ;;  %p54_p0 = scmp.ne.s32.totalorder %s737_s11, %s733_s10 }
   0x9   : > { %p45_p1 = scmp.eq.s32.totalorder %s44_s17, 0  ;;  %p55_p2 = scmp.eq.s32.totalorder %s741_s12, 0 }
   0xa   : > { %p60_p3 = scmp.ne.s32.totalorder %s733_s10, %s729_s9  ;;  %p1022_p4 = scmp.eq.s32.totalorder %s791_s13, 0 }
   0xb   : > { %s807_s18 = scalar_select %p45_p1, %s737_s11, %s47_s16  }
   0xc   : > { %p809_p5 = por %p55_p2, %p54_p0  ;;  %p815_p6 = por %p1022_p4, %p60_p3 }
   0xd   : > { %p84_p7 = scmp.eq.s32.totalorder %s791_s13, 1  ;;  %p90_p8 = scmp.eq.s32.totalorder %s505_s14, 1 }
   0xe   : > { %s1026_s19 = scalar_select %p809_p5, 1, 0 }
   0xf   : > { %s1027_s20 = scalar_select %p815_p6, 1, 0 }
  0x10   : > { %p506_p9 = scmp.ge.s32.totalorder %s741_s12, 1  ;;  %p97_p10 = scmp.lt.s32.totalorder %s741_s12, 3 }
  0x11   : > { %p822_p11 = por %p84_p7, %p54_p0  ;;  %p826_p12 = por %p90_p8, %p60_p3 }
  0x12   : > { %p830_p13 = pnand %p506_p9, %p97_p10  ;;  %s743_s24 = smov [#allocation2]  }
  0x13   : > { %s1028_s21 = scalar_select %p822_p11, 1, 0 }
  0x14   : > { %s1029_s22 = scalar_select %p826_p12, 1, 0 }
  0x15   : > { %s1030_s23 = scalar_select %p830_p13, 1, 0 }
  0x16   : > { %p555_p1 = pneg %p830_p13  ;;  %s109_s25 = sshll.u32 %s743_s24, 4  ;;  %s110_s25 = int_to_ptr.vmem [resolvable:$true] %s109_s25 }
  0x17   : > { %s123_s27 = sand.u32 1, %s737_s11   ;;  %s613_s30 = scalar_lea.hbm %s1019_s0, 512 }
  0x18   : > { %p838_p2 = pnand %p555_p1, %p1022_p4  ;;  %p614_p7 = scmp.ne.s32.totalorder %s1019_s0, %s613_s30 }
  0x19   : > { %p620_p1 = scmp.lt.u32.totalorder %s613_s30, %s1019_s0 }
  0x1a   : > { %p615_p8 = pneg %p838_p2 }
  0x1c   : > { %p616_p9 = pnand %p615_p8, %p614_p7 }
  0x1e   : > { %p617_p10 = pneg %p616_p9 }
  0x20   : > { %p622_p4 = pnand %p620_p1, %p617_p10 }
  0x22   : > { %625 = shalt.err (!%p622_p4)
}
  0x23   : > { %s626_s7 = scalar_lea.vmem %s110_s25, 512  ;;  %p634_p11 = scmp.lt.s32.totalorder %s110_s25, %s110_s25 }
  0x24   : > { %p627_p0 = scmp.ne.s32.totalorder %s110_s25, %s626_s7  ;;  %p635_p6 = scmp.lt.s32.totalorder %s626_s7, %s626_s7 }
  0x26   : > { %p629_p3 = pnand %p627_p0, %p615_p8  ;;  %p636_p13 = por %p635_p6, %p634_p11 }
  0x28   : > { %p630_p12 = pneg %p629_p3 }
  0x2a   : > { %p637_p5 = pnand %p636_p13, %p630_p12 }
  0x2c   : > { %640 = shalt.err (!%p637_p5)
}
  0x2d   : > { %s744_s8 = smov 128   ;;  %s745_s14 = smov 8  }
  0x2e   : > { %558 = dma.hbm_to_vmem [thread:$0]  (!%p838_p2), %s1019_s0, 512, %s110_s25, [#allocation3], %s744_s8, %s744_s8, %s745_s14  }
  0x2f   : > { %p1032_p4 = scmp.ne.s32.totalorder %s1026_s19, 0  ;;  %p1033_p7 = scmp.lt.s32.totalorder %s741_s12, 2 }
  0x30   : > { %s509_s28 = sshll.u32 %s123_s27, 7  ;;  %s529_s29 = sshll.u32 %s741_s12, 9 }
  0x31   : > { %p865_p0 = pnand %p1033_p7, %p1032_p4  ;;  %s873_s4 = scalar_lea.hbm %s1020_s1, %s529_s29 }
  0x32   : > { %s127_s25 = scalar_lea.vmem [#allocation5], %s509_s28  ;;  %s877_s26 = scalar_lea.sflag [#allocation6], %s123_s27 }
  0x33   : > { %s134_s19 = sshll.u32 %s127_s25, 4  ;;  %s641_s5 = scalar_lea.hbm %s873_s4, 2048  ;;  %s875_s19 = int_to_ptr.vmem [resolvable:$true] %s134_s19 }
  0x34   : > { %p642_p5 = scmp.ne.s32.totalorder %s873_s4, %s641_s5  ;;  %p643_p6 = pneg %p865_p0 }
  0x35   : > { %s646_s8 = scalar_lea.hbm %s1020_s1, 4096  ;;  %p647_p13 = scmp.lt.u32.totalorder %s873_s4, %s1020_s1 }
  0x36   : > { %p644_p11 = pnand %p643_p6, %p642_p5  ;;  %p648_p2 = scmp.lt.u32.totalorder %s646_s8, %s641_s5 }
  0x37   : > { %p650_p8 = scmp.lt.u32.totalorder %s641_s5, %s873_s4 }
  0x38   : > { %p645_p12 = pneg %p644_p11  ;;  %p649_p3 = por %p648_p2, %p647_p13 }
  0x3a   : > { %p651_p9 = por %p650_p8, %p649_p3 }
  0x3c   : > { %p652_p10 = pnand %p651_p9, %p645_p12 }
  0x3e   : > { %655 = shalt.err (!%p652_p10)
}
  0x3f   : > { %s656_s27 = scalar_lea.vmem %s875_s19, 2048  ;;  %s746_s17 = smov [#allocation5]  }
  0x40   : > { %p657_p1 = scmp.ne.s32.totalorder %s875_s19, %s656_s27  ;;  %s661_s28 = sshll.u32 %s746_s17, 4  ;;  %s662_s28 = int_to_ptr.vmem [resolvable:$false] %s661_s28 }
  0x41   : > { %s663_s29 = scalar_lea.vmem %s662_s28, 4096  ;;  %p664_p5 = scmp.lt.s32.totalorder %s875_s19, %s662_s28 }
  0x42   : > { %p659_p4 = pnand %p657_p1, %p643_p6  ;;  %p665_p11 = scmp.lt.s32.totalorder %s663_s29, %s656_s27 }
  0x44   : > { %p660_p7 = pneg %p659_p4  ;;  %p666_p13 = por %p665_p11, %p664_p5 }
  0x46   : > { %p667_p2 = pnand %p666_p13, %p660_p7 }
  0x48   : > { %670 = shalt.err (!%p667_p2)
}
  0x49   : > { %s747_s30 = smov 1024   ;;  %s748_s3 = smov 512  }
  0x4a   : > { %s749_s25 = smov 32   ;;  %p1035_p6 = scmp.ne.s32.totalorder %s1030_s23, 0 }
  0x4b   : > { %562 = dma.hbm_to_vmem [thread:$0]  (!%p865_p0), %s873_s4, 2048, %s875_s19, %s877_s26, %s747_s30, %s748_s3, %s749_s25  }
  0x4c   : > { %146 = sbr.rel (%p1035_p6) target bundleno = 342 (0x156), region = 28  ;;  %p1036_p12 = scmp.eq.s32.totalorder (!%p1035_p6), %s791_s13, 0 }
  0x53   : > { %716 = dma.done.wait (%p1036_p12), [#allocation3], 512   ;;  %p1037_p3 = pmov %p1036_p12 }
  0x54   : > { %s912_s5 = sand.u32 1, %s733_s10   ;;  %p1038_p0 = scmp.ne.s32.totalorder %s1027_s20, 0 }
  0x55   : > { %718 = vsyncadd (%p1037_p3), [#allocation3], 4294966784  ;;  %s514_s6 = sshll.u32 %s912_s5, 7  ;;  %s153_s7 = scalar_lea.sflag [#allocation6], %s912_s5 }
  0x56   : > { %s918_s24 = scalar_lea.vmem [#allocation5], %s514_s6 }
  0x57   : > { %720 = dma.done.wait (%p1038_p0), %s153_s7, 2048  }
  0x58   : > { %722 = vsyncadd (%p1038_p0), %s153_s7, 4294965248  ;;  %v750_v0 = vmov 0.0   ;;  %v184_v1 = vld [vmem:[%s918_s24 + $0x8] sm:$0xff]  ;;  %v186_v3 = vld [vmem:[%s918_s24 + $0x18] sm:$0xff]  ;;  %vm199_vm0 = vcmask 261120   ;;  %s950_s20 = scalar_lea.vmem [#allocation7], %s514_s6 }
  0x59   : > { %276 = vmatprep.mubr.f32.mxu0 %v750_v0  ;;  %365 = vmatprep.mubr.f32.mxu1 %v750_v0  ;;  %v188_v2 = vld [vmem:[%s918_s24 + $0x28] sm:$0xff]  ;;  %v190_v5 = vld [vmem:[%s918_s24 + $0x38] sm:$0xff]  ;;  %v183_v6 = vld [vmem:[%s918_s24] sm:$0xff]  ;;  %s530_s23 = sshll.u32 %s791_s13, 9  ;;  %s420_s4 = sshll.u32 %s950_s20, 4  ;;  %s971_s4 = int_to_ptr.vmem [resolvable:$true] %s420_s4 }
  0x5a   : > { %v531_v4 = vpack.c.bf16 %v188_v2, %v184_v1  ;;  %v187_v7 = vld [vmem:[%s918_s24 + $0x20] sm:$0xff]  ;;  %v539_v8 = vpack.c.bf16 %v190_v5, %v186_v3  ;;  %v185_v10 = vld [vmem:[%s918_s24 + $0x10] sm:$0xff]  ;;  %v192_v12 = vld [vmem:[%s918_s24 + $0x48] sm:$0xff]  ;;  %s969_s8 = scalar_lea.hbm %s1021_s2, %s530_s23  ;;  %s407_s13 = scalar_lea.sflag [#allocation4], %s912_s5 }
  0x5b   : > { %v533_v9 = vpack.c.bf16 %v187_v7, %v183_v6  ;;  %v189_v11 = vld [vmem:[%s918_s24 + $0x30] sm:$0xff]  ;;  %v196_v14 = vld [vmem:[%s918_s24 + $0x68] sm:$0xff]  ;;  %v194_v15 = vld [vmem:[%s918_s24 + $0x58] sm:$0xff]  ;;  %s671_s14 = scalar_lea.vmem %s971_s4, 2048  ;;  %p1039_p9 = scmp.ne.s32.totalorder %s1028_s21, 0 }
  0x5c   : > { %532 = vmatprep.subr.bf16.mxu0 %v531_v4  ;;  %v541_v13 = vpack.c.bf16 %v189_v11, %v185_v10  ;;  %v198_v16 = vld [vmem:[%s918_s24 + $0x78] sm:$0xff]  ;;  %540 = vmatprep.subr.bf16.mxu1 %v539_v8  ;;  %v535_v17 = vpack.c.bf16 %v196_v14, %v192_v12  ;;  %v191_v19 = vld [vmem:[%s918_s24 + $0x40] sm:$0xff]  ;;  %v193_v21 = vld [vmem:[%s918_s24 + $0x50] sm:$0xff]  ;;  %p672_p8 = scmp.ne.s32.totalorder %s971_s4, %s671_s14  ;;  %s751_s16 = smov [#allocation7]  }
  0x5d   : > { %534 = vmatpush1.bf16.msra.mxu0 %v533_v9  ;;  %v543_v18 = vpack.c.bf16 %v198_v16, %v194_v15  ;;  %v195_v20 = vld [vmem:[%s918_s24 + $0x60] sm:$0xff]  ;;  %v197_v23 = vld [vmem:[%s918_s24 + $0x70] sm:$0xff]  ;;  %v180_v26 = vld [vmem:[#allocation2 + $0x8] sm:$0xff]  ;;  %s675_s27 = sshll.u32 %s751_s16, 4  ;;  %s676_s27 = int_to_ptr.vmem [resolvable:$false] %s675_s27 }
  0x5e   : > { %542 = vmatpush1.bf16.msra.mxu1 %v541_v13  ;;  %v537_v22 = vpack.c.bf16 %v195_v20, %v191_v19  ;;  %536 = vmatprep.subr.bf16.mxu0 %v535_v17  ;;  %v545_v24 = vpack.c.bf16 %v197_v23, %v193_v21  ;;  %v179_v25 = vld [vmem:[#allocation2] sm:$0xff]  ;;  %v181_v27 = vld [vmem:[#allocation2 + $0x10] sm:$0xff]  ;;  %v182_v28 = vld [vmem:[#allocation2 + $0x18] sm:$0xff]  ;;  %p673_p10 = pnand %p672_p8, %p1039_p9  ;;  %s677_s17 = scalar_lea.vmem %s676_s27, 4096 }
  0x5f   : > { %544 = vmatprep.subr.bf16.mxu1 %v543_v18  ;;  %p678_p4 = scmp.lt.s32.totalorder %s971_s4, %s676_s27  ;;  %p679_p7 = scmp.lt.s32.totalorder %s677_s17, %s671_s14 }
  0x60   : > { %p674_p1 = pneg %p673_p10 }
  0x61   : > { %538 = vmatpush1.bf16.msra.mxu0 %v537_v22  ;;  %p680_p5 = por %p679_p7, %p678_p4 }
  0x62   : > { %546 = vmatpush1.bf16.msra.mxu1 %v545_v24 }
  0x63   : > { %p681_p11 = pnand %p680_p5, %p674_p1 }
  0x64   : > { %516 = vmatmul.mubr.msk.f32.vlgmr.msra.gmra.mrb[0].mxu0 %vm199_vm0, %v179_v25 }
  0x65   : > { %520 = vmatmul.mubr.msk.f32.vlgmr.msra.gmra.mrb[0].mxu1 %vm199_vm0, %v179_v25  ;;  %282 = vmatprep.mubr.f32.mxu0 %v750_v0 }
  0x66   : > { %371 = vmatprep.mubr.f32.mxu1 %v750_v0 }
  0x68   : > { %517 = vmatmul.mubr.msk.f32.gmra.mrb[2].mxu0 %vm199_vm0, %v180_v26 }
  0x69   : > { %521 = vmatmul.mubr.msk.f32.gmra.mrb[2].mxu1 %vm199_vm0, %v180_v26  ;;  %288 = vmatprep.mubr.f32.mxu0 %v750_v0 }
  0x6a   : > { %377 = vmatprep.mubr.f32.mxu1 %v750_v0 }
  0x6c   : > { %518 = vmatmul.mubr.msk.f32.gmra.mrb[4].mxu0 %vm199_vm0, %v181_v27 }
  0x6d   : > { %522 = vmatmul.mubr.msk.f32.gmra.mrb[4].mxu1 %vm199_vm0, %v181_v27  ;;  %294 = vmatprep.mubr.f32.mxu0 %v750_v0 }
  0x6e   : > { %383 = vmatprep.mubr.f32.mxu1 %v750_v0 }
  0x70   : > { %519 = vmatmul.mubr.msk.f32.gmra.mrb[6].mxu0 %vm199_vm0, %v182_v28 }
  0x71   : > { %523 = vmatmul.mubr.msk.f32.gmra.mrb[6].mxu1 %vm199_vm0, %v182_v28 }
 0x137   : > { %v278_v29 = vpop.f32.mrb[0].mxu0 }
 0x138   : > { %390 = vst [vmem:[%s950_s20] sm:$0xff] %v278_v29  ;;  %v367_v30 = vpop.f32.mrb[0].mxu1  ;;  %v280_v31 = vpop.f32.mrb[1].mxu0 }
 0x139   : > { %392 = vst [vmem:[%s950_s20 + $0x10] sm:$0xff] %v367_v30  ;;  %391 = vst [vmem:[%s950_s20 + $0x8] sm:$0xff] %v280_v31  ;;  %v369_v32 = vpop.f32.mrb[1].mxu1 }
 0x13a   : > { %393 = vst [vmem:[%s950_s20 + $0x18] sm:$0xff] %v369_v32 }
 0x13b   : > { %v284_v33 = vpop.f32.mrb[2].mxu0 }
 0x13c   : > { %394 = vst [vmem:[%s950_s20 + $0x20] sm:$0xff] %v284_v33  ;;  %v373_v34 = vpop.f32.mrb[2].mxu1  ;;  %v286_v35 = vpop.f32.mrb[3].mxu0 }
 0x13d   : > { %396 = vst [vmem:[%s950_s20 + $0x30] sm:$0xff] %v373_v34  ;;  %395 = vst [vmem:[%s950_s20 + $0x28] sm:$0xff] %v286_v35  ;;  %v375_v36 = vpop.f32.mrb[3].mxu1 }
 0x13e   : > { %397 = vst [vmem:[%s950_s20 + $0x38] sm:$0xff] %v375_v36 }
 0x13f   : > { %v290_v37 = vpop.f32.mrb[4].mxu0 }
 0x140   : > { %398 = vst [vmem:[%s950_s20 + $0x40] sm:$0xff] %v290_v37  ;;  %v379_v38 = vpop.f32.mrb[4].mxu1  ;;  %v292_v39 = vpop.f32.mrb[5].mxu0 }
 0x141   : > { %400 = vst [vmem:[%s950_s20 + $0x50] sm:$0xff] %v379_v38  ;;  %399 = vst [vmem:[%s950_s20 + $0x48] sm:$0xff] %v292_v39  ;;  %v381_v40 = vpop.f32.mrb[5].mxu1 }
 0x142   : > { %401 = vst [vmem:[%s950_s20 + $0x58] sm:$0xff] %v381_v40 }
 0x143   : > { %v296_v41 = vpop.f32.mrb[6].mxu0 }
 0x144   : > { %402 = vst [vmem:[%s950_s20 + $0x60] sm:$0xff] %v296_v41  ;;  %v385_v42 = vpop.f32.mrb[6].mxu1  ;;  %v298_v43 = vpop.f32.mrb[7].mxu0 }
 0x145   : > { %404 = vst [vmem:[%s950_s20 + $0x70] sm:$0xff] %v385_v42  ;;  %403 = vst [vmem:[%s950_s20 + $0x68] sm:$0xff] %v298_v43  ;;  %v387_v44 = vpop.f32.mrb[7].mxu1 }
 0x146   : > { %405 = vst [vmem:[%s950_s20 + $0x78] sm:$0xff] %v387_v44 }
 0x147   : > { %684 = shalt.err (!%p681_p11)
}
 0x148   : > { %s685_s28 = scalar_lea.hbm %s969_s8, 2048  ;;  %s689_s3 = scalar_lea.hbm %s1021_s2, 4096 }
 0x149   : > { %p686_p13 = scmp.ne.s32.totalorder %s969_s8, %s685_s28  ;;  %p690_p12 = scmp.lt.u32.totalorder %s969_s8, %s1021_s2 }
 0x14a   : > { %p691_p3 = scmp.lt.u32.totalorder %s689_s3, %s685_s28  ;;  %p693_p8 = scmp.lt.u32.totalorder %s685_s28, %s969_s8 }
 0x14b   : > { %p687_p2 = pnand %p686_p13, %p1039_p9 }
 0x14c   : > { %p692_p0 = por %p691_p3, %p690_p12 }
 0x14d   : > { %p688_p6 = pneg %p687_p2 }
 0x14e   : > { %p694_p10 = por %p693_p8, %p692_p0 }
 0x150   : > { %p695_p1 = pnand %p694_p10, %p688_p6 }
 0x152   : > { %698 = shalt.err (!%p695_p1)
}
 0x153   : > { %s752_s7 = smov 512   ;;  %s753_s24 = smov 1024  }
 0x154   : > { %s754_s20 = smov 32  }
 0x155   : > { %553 = dma.vmem_to_hbm [thread:$0]  (%p1039_p9), %s971_s4, 2048, %s969_s8, %s407_s13, %s752_s7, %s753_s24, %s754_s20  }
 0x156 PF: > { %s435_s23 = sand.u32 1, %s729_s9   ;;  %p1040_p4 = scmp.ne.s32.totalorder %s1029_s22, 0 }
 0x157   : > { %p1041_p7 = scmp.ge.s32.totalorder %s741_s12, 2  ;;  %s436_s19 = scalar_lea.sflag [#allocation4], %s435_s23 }
 0x159   : > { %p564_p5 = pnand %p1041_p7, %p1040_p4 }
 0x15b   : > { %724 = dma.done.wait (!%p564_p5), %s436_s19, 2048  }
 0x15c   : > { %726 = vsyncadd (!%p564_p5), %s436_s19, 4294965248  ;;  %p16_p11 = scmp.ge.s32.totalorder %s795_s15, 4   ;;  %s1042_s9 = smov %s733_s10 }
 0x15d   : > { %s1043_s10 = smov %s737_s11  ;;  %s1044_s11 = smov %s807_s18 }
 0x15e   : > { %s1045_s12 = smov %s795_s15  ;;  %18 = sbr.rel (!%p16_p11) target bundleno = 6 (0x6), region = 78 }
 0x165   :  { %441 = vsyncpa [#allocation3], 1 }
 0x166   :  { %443 = vsyncpa [#allocation3 + $0x1], 1 }
 0x167   :  { %444 = vsyncpa [#allocation6], 1 }
 0x168   :  { %446 = vsyncpa [#allocation6 + $0x1], 1 }
 0x169   :  { %447 = vsyncpa [#allocation4], 1 }
 0x16a   :  { %449 = vsyncpa [#allocation4 + $0x1], 1 }

</bundles_post_ra>
